<compile_context>
chip_gen: v7x
topology: tpu7x:2x2x1
jax: 0.10.0
libtpu: 0.0.40
codegen_flags: <defaults>
</compile_context>

<pallas_src>
import functools

import jax
import jax.numpy as jnp
from jax import lax
from jax.experimental import pallas as pl
from jax.experimental.pallas import tpu as pltpu

_BN_EPS = 1e-5
USE_BF16_MATMUL = True          # 1x1 convs: bf16 MXU inputs, f32 accumulation.

_VMEM_SPEC = pl.BlockSpec(memory_space=pltpu.MemorySpace.VMEM)


# ----------------------------- in-kernel helpers -----------------------------
def _erf(x):
    # Abramowitz & Stegun 7.1.26, max abs error ~1.5e-7.
    # TODO(synk): Mosaic has no guaranteed native erf lowering; this polynomial
    # reproduces torch.nn.GELU()'s exact-erf GELU to f32-level accuracy.
    a1, a2, a3, a4, a5 = 0.254829592, -0.284496736, 1.421413741, -1.453152027, 1.061405429
    p = 0.3275911
    sgn = jnp.where(x >= 0.0, 1.0, -1.0)
    ax = jnp.abs(x)
    t = 1.0 / (1.0 + p * ax)
    poly = ((((a5 * t + a4) * t + a3) * t + a2) * t + a1) * t
    return sgn * (1.0 - poly * jnp.exp(-ax * ax))


def _gelu(x):
    return 0.5 * x * (1.0 + _erf(x * 0.7071067811865476))


def _bn_train(h, gamma, beta):
    # Training-mode BatchNorm over axis 0 (= N*H*W) per channel, biased variance,
    # two-pass (mean first, then mean of centered squares) for numerical stability.
    mean = jnp.mean(h, axis=0, keepdims=True)
    d = h - mean
    var = jnp.mean(d * d, axis=0, keepdims=True)
    return d * lax.rsqrt(var + _BN_EPS) * gamma + beta


def _channel_tile(dim):
    # Lane-dense 128-wide channel tiles when possible, otherwise a single full tile.
    return 128 if dim % 128 == 0 else dim


# ------------------------- roll direction probe --------------------------------
@functools.lru_cache(maxsize=None)
def _probe_roll_sign():
    """Pin down pltpu.roll's rotation direction with a tiny eager kernel.

    Returns +1 if pltpu.roll matches np.roll (out[i] = x[i - shift]), else -1.
    Must be called OUTSIDE jit tracing (it is: once in __main__).
    """
    def k(x_ref, o_ref):
        o_ref[...] = pltpu.roll(x_ref[...], 1, axis=0)

    x = jnp.broadcast_to(jnp.arange(8, dtype=jnp.float32)[:, None], (8, 128))
    out = pl.pallas_call(
        k,
        out_shape=jax.ShapeDtypeStruct((8, 128), jnp.float32),
        in_specs=[_VMEM_SPEC],
        out_specs=_VMEM_SPEC,
    )(x)
    return 1 if bool(out[0, 0] == 7.0) else -1


# --------------------------- patch embed kernel -------------------------------
def _patch_kernel(p_ref, w_ref, b_ref, g_ref, bt_ref, o_ref):
    # (M, K=12) @ (K, TC) + bias -> GELU -> train-mode BN over M.
    # K=12 wastes MXU width but runs once per forward (review: minor, leave as-is).
    h = jnp.dot(p_ref[...], w_ref[...], preferred_element_type=jnp.float32) + b_ref[...]
    h = _gelu(h)
    o_ref[...] = _bn_train(h, g_ref[...], bt_ref[...])


def patch_embed_gelu_bn(patches, w, b, gamma, beta):
    m, k = patches.shape
    dim = w.shape[1]
    tc = _channel_tile(dim)
    return pl.pallas_call(
        _patch_kernel,
        out_shape=jax.ShapeDtypeStruct((m, dim), jnp.float32),
        grid=(dim // tc,),
        in_specs=[
            pl.BlockSpec((m, k), lambda j: (0, 0)),     # im2col patches (resident)
            pl.BlockSpec((k, tc), lambda j: (0, j)),    # weight column tile
            pl.BlockSpec((1, tc), lambda j: (0, j)),    # bias
            pl.BlockSpec((1, tc), lambda j: (0, j)),    # gamma
            pl.BlockSpec((1, tc), lambda j: (0, j)),    # beta
        ],
        out_specs=pl.BlockSpec((m, tc), lambda j: (0, j)),
        compiler_params=pltpu.CompilerParams(dimension_semantics=("parallel",)),
    )(patches, w, b.reshape(1, dim), gamma.reshape(1, dim), beta.reshape(1, dim))


# ----------------------- fused 8-block ConvMixer kernel ------------------------
def _blocks_kernel(x_ref, dww_ref, dwb_ref, dwg_ref, dwbt_ref,
                   pww_ref, pwb_ref, pwg_ref, pwbt_ref,
                   o_ref, pad_ref, *, roll_sign):
    blk = pl.program_id(0)
    b, hp, wp, dim = x_ref.shape
    wpad = pad_ref.shape[2]
    m = b * hp * wp
    ct = 128 if dim % 128 == 0 else dim          # lane-tile chunk for the depthwise stage
    n_ct = dim // ct

    # Block 0: zero the border of the persistent padded-activation scratch ONCE and
    # seed its interior with the patch-embed output.  The border (H rows 0,1 and
    # hp+2..hp+3; W rows wp..wpad-1) is never written again; the interior is fully
    # overwritten at the end of every grid step (activation carry stays in VMEM).
    @pl.when(blk == 0)
    def _init():
        pad_ref[...] = jnp.zeros_like(pad_ref)
        pad_ref[:, 2:2 + hp, 0:wp, :] = x_ref[...]

    # Residual input for this block (aligned read of the interior).
    x_res = pad_ref[:, 2:2 + hp, 0:wp, :].reshape(m, dim)

    # ---- depthwise 5x5 'same' conv -------------------------------------------
    # Activation sits at W offset 0 of the wpad(>= wp+2, multiple of 8)-wide zero
    # padded scratch, so each dx shift is an XLU sublane roll whose wrap-around
    # lands in the all-zero columns; all loads stay (8,128)-aligned.  The 25 taps
    # accumulate in registers (no spill scratch).
    dw_parts = []
    for ci in range(n_ct):
        c0 = ci * ct
        acc = None
        for dy in range(5):
            slab = pad_ref[:, dy:dy + hp, :, c0:c0 + ct].reshape(b * hp, wpad, ct)
            for dx in range(5):
                idx = dy * 5 + dx
                shift = (roll_sign * (2 - dx)) % wpad
                rolled = pltpu.roll(slab, shift, axis=1) if shift else slab
                tap = rolled[:, 0:wp, :] * dww_ref[idx:idx + 1, c0:c0 + ct]
                acc = tap if acc is None else acc + tap
        dw_parts.append(acc.reshape(m, ct))
    dw = dw_parts[0] if n_ct == 1 else jnp.concatenate(dw_parts, axis=-1)

    # GELU -> train-mode BN (stats over all N*H*W) -> residual add.
    h = _gelu(dw + dwb_ref[...])
    h = _bn_train(h, dwg_ref[...], dwbt_ref[...])
    h = h + x_res

    # ---- 1x1 conv: single full-K MXU matmul (bf16 inputs / f32 accumulation) ----
    y = jnp.dot(h.astype(pww_ref.dtype), pww_ref[...],
                preferred_element_type=jnp.float32)
    y = _gelu(y + pwb_ref[...])
    y = _bn_train(y, pwg_ref[...], pwbt_ref[...])

    # Carry the activation to the next block iteration (VMEM-resident, no HBM trip).
    pad_ref[:, 2:2 + hp, 0:wp, :] = y.reshape(b, hp, wp, dim)

    # Only the final block's activation goes to HBM.
    @pl.when(blk == pl.num_programs(0) - 1)
    def _finish():
        o_ref[...] = y


def convmixer_blocks(x, blocks, roll_sign):
    # x: (B, Hp, Wp, C) NHWC activation; returns (B*Hp*Wp, C) after all blocks.
    b, hp, wp, dim = x.shape
    nb = len(blocks)
    m = b * hp * wp
    # Padded-W width: >= wp + 2 so the roll wrap region is all-zero, rounded up to a
    # sublane multiple so interior stores/loads are unmasked.
    wpad = max(8, ((wp + 4 + 7) // 8) * 8)

    stack = lambda key, shp: jnp.stack([blk[key].reshape(shp) for blk in blocks])
    dw_w = stack("dw_w", (25, dim))
    dw_b = stack("dw_b", (1, dim))
    dw_g = stack("dw_gamma", (1, dim))
    dw_bt = stack("dw_beta", (1, dim))
    pw_w = jnp.stack([blk["pw_w"] for blk in blocks])          # (nb, dim, dim)
    if USE_BF16_MATMUL:
        pw_w = pw_w.astype(jnp.bfloat16)                       # halves weight DMA
    pw_b = stack("pw_b", (1, dim))
    pw_g = stack("pw_gamma", (1, dim))
    pw_bt = stack("pw_beta", (1, dim))

    kernel = functools.partial(_blocks_kernel, roll_sign=roll_sign)
    vec_spec = pl.BlockSpec((None, 1, dim), lambda i: (i, 0, 0))
    return pl.pallas_call(
        kernel,
        out_shape=jax.ShapeDtypeStruct((m, dim), jnp.float32),
        grid=(nb,),
        in_specs=[
            pl.BlockSpec((b, hp, wp, dim), lambda i: (0, 0, 0, 0)),   # initial act
            pl.BlockSpec((None, 25, dim), lambda i: (i, 0, 0)),       # dw taps / block
            vec_spec,                                                 # dw bias
            vec_spec,                                                 # dw gamma
            vec_spec,                                                 # dw beta
            pl.BlockSpec((None, dim, dim), lambda i: (i, 0, 0)),      # pw weight / block
            vec_spec,                                                 # pw bias
            vec_spec,                                                 # pw gamma
            vec_spec,                                                 # pw beta
        ],
        out_specs=pl.BlockSpec((m, dim), lambda i: (0, 0)),
        scratch_shapes=[
            pltpu.VMEM((b, hp + 4, wpad, dim), jnp.float32),   # persistent padded act
        ],
        compiler_params=pltpu.CompilerParams(
            dimension_semantics=("arbitrary",)),   # sequential: activation carry
    )(x, dw_w, dw_b, dw_g, dw_bt, pw_w, pw_b, pw_g, pw_bt)


# ----------------------------- pool + linear ----------------------------------
def _pool_linear_kernel(h_ref, w_ref, b_ref, o_ref):
    # AdaptiveAvgPool2d((1,1)) + Flatten + Linear(dim, 10).
    h = h_ref[...]                                          # (B, Hp, Wp, C)
    inv_n = 1.0 / float(h.shape[1] * h.shape[2])
    pooled = jnp.sum(jnp.sum(h, axis=1), axis=1) * inv_n    # (B, C)
    o_ref[...] = jnp.dot(pooled, w_ref[...], preferred_element_type=jnp.float32) + b_ref[...]


def pool_linear(h, w, b):
    bsz = h.shape[0]
    n_out = w.shape[1]
    return pl.pallas_call(
        _pool_linear_kernel,
        out_shape=jax.ShapeDtypeStruct((bsz, n_out), jnp.float32),
        in_specs=[_VMEM_SPEC] * 3,
        out_specs=_VMEM_SPEC,
    )(h, w, b.reshape(1, n_out))


# -------------------------------- forward pass --------------------------------
def conv_max_spread_forward(x_nchw, params, roll_sign=1):
    x = jnp.transpose(x_nchw, (0, 2, 3, 1)).astype(jnp.float32)   # NCHW -> NHWC
    b, hh, ww, cin = x.shape
    dim = params["patch_w"].shape[1]
    hp, wp = hh // 2, ww // 2
    m = b * hp * wp

    # Conv2d(3, dim, kernel=2, stride=2) == non-overlapping 2x2 patch im2col matmul.
    patches = (x.reshape(b, hp, 2, wp, 2, cin)
                .transpose(0, 1, 3, 2, 4, 5)
                .reshape(m, 4 * cin))
    h = patch_embed_gelu_bn(patches, params["patch_w"], params["patch_b"],
                            params["patch_gamma"], params["patch_beta"])
    h = h.reshape(b, hp, wp, dim)

    # All 8 ConvMixer blocks in one pallas_call; activation stays in VMEM between
    # blocks (1 HBM read + 1 HBM write total for the whole stack).
    h = convmixer_blocks(h, params["blocks"], roll_sign).reshape(b, hp, wp, dim)

    return pool_linear(h, params["lin_w"], params["lin_b"])


# ------------------------------ parameter init --------------------------------
def init_params(key, dim=256, num_blocks=8, num_classes=10, in_ch=3):
    keys = iter(jax.random.split(key, 8 * num_blocks + 8))
    nk = lambda: next(keys)
    f32 = jnp.float32
    p = {
        # patch-embed weight in (kh*kw*cin, dim) layout (dy, dx, ci ordering);
        # importing real PyTorch Conv2d weights (out,in,kh,kw) needs a transpose.
        "patch_w": 0.3 * jax.random.normal(nk(), (2 * 2 * in_ch, dim), f32),
        "patch_b": 0.1 * jax.random.normal(nk(), (dim,), f32),
        "patch_gamma": 1.0 + 0.1 * jax.random.normal(nk(), (dim,), f32),
        "patch_beta": 0.1 * jax.random.normal(nk(), (dim,), f32),
        "blocks": [],
        "lin_w": (1.0 / jnp.sqrt(dim)) * jax.random.normal(nk(), (dim, num_classes), f32),
        "lin_b": 0.1 * jax.random.normal(nk(), (num_classes,), f32),
    }
    for _ in range(num_blocks):
        p["blocks"].append({
            "dw_w": 0.2 * jax.random.normal(nk(), (5, 5, dim), f32),   # per-channel 5x5 taps
            "dw_b": 0.1 * jax.random.normal(nk(), (dim,), f32),
            "dw_gamma": 1.0 + 0.1 * jax.random.normal(nk(), (dim,), f32),
            "dw_beta": 0.1 * jax.random.normal(nk(), (dim,), f32),
            "pw_w": (1.0 / jnp.sqrt(dim)) * jax.random.normal(nk(), (dim, dim), f32),
            "pw_b": 0.1 * jax.random.normal(nk(), (dim,), f32),
            "pw_gamma": 1.0 + 0.1 * jax.random.normal(nk(), (dim,), f32),
            "pw_beta": 0.1 * jax.random.normal(nk(), (dim,), f32),
        })
    return p


if __name__ == "__main__":
    key = jax.random.PRNGKey(0)
    kx, kp = jax.random.split(key)

    dim = 256                                    # module default; lane-dense (2 x 128-tiles)
    x = jax.random.normal(kx, (2, 3, 16, 16), jnp.float32)   # NCHW, like the PyTorch input
    params = init_params(kp, dim=dim, num_blocks=8)

    roll_sign = _probe_roll_sign()               # eager one-off probe, outside jit
    fwd = jax.jit(functools.partial(conv_max_spread_forward, roll_sign=roll_sign))
    out = jax.block_until_ready(fwd(x, params))

    assert out.shape == (2, 10), out.shape
    assert bool(jnp.all(jnp.isfinite(out))), "non-finite output"
    print("KERNEL_OK")
</pallas_src>

<mosaic_0001>
module attributes {stable_mosaic.version = 11 : i64} {
  func.func @k(%arg0: memref<8x128xf32, #tpu.memory_space<vmem>>, %arg1: memref<8x128xf32, #tpu.memory_space<vmem>>) attributes {dimension_semantics = [], scalar_prefetch = 0 : i64, scratch_operands = 0 : i64, tpu.core_type = #tpu.core_type<tc>} {
    %c0 = arith.constant 0 : index
    %c0_0 = arith.constant 0 : index
    %0 = vector.load %arg0[%c0, %c0_0] : memref<8x128xf32, #tpu.memory_space<vmem>>, vector<8x128xf32>
    %c1_i32 = arith.constant 1 : i32
    %1 = tpu.dynamic_rotate %0 by %c1_i32 dim 0 : vector<8x128xf32>, i32 -> vector<8x128xf32>
    %c0_1 = arith.constant 0 : index
    %c0_2 = arith.constant 0 : index
    %2 = vector.load %arg1[%c0_1, %c0_2] : memref<8x128xf32, #tpu.memory_space<vmem>>, vector<8x128xf32>
    tpu.vector_store %arg1[%c0_1, %c0_2], %1 {strides = array<i32>} : memref<8x128xf32, #tpu.memory_space<vmem>>, vector<8x128xf32>,
    return
  }
}

</mosaic_0001>

<bundles_post_ra>
// kernel: tpu_custom_call.1
= control target key start
LH: loop header
LB: loop body
LE: loop exit
PB: predicated region body
PF: predicated region fallthrough
CT: control target
= control target key end

     0   :  { %6 = vsyncpa [#allocation3], 0  ;;  %s125_s0 = inlined_call_operand.hbm [shape: f32[8,128], index: 0, kind: input, shape index: {}]   ;;  %s126_s1 = inlined_call_operand.hbm [shape: f32[8,128], index: 1, kind: output, shape index: {}]  }
   0x1   :  { %7 = vsyncpa [#allocation4], 0  ;;  %s89_s6 = smov [#allocation2]   ;;  %s41_s10 = scalar_lea.hbm %s125_s0, 128 }
   0x2   :  { %s14_s7 = sshll.u32 %s89_s6, 4  ;;  %p42_p0 = scmp.ne.s32.totalorder %s125_s0, %s41_s10  ;;  %s15_s7 = int_to_ptr.vmem [resolvable:$true] %s14_s7 }
   0x3   :  { %p45_p1 = scmp.lt.u32.totalorder %s41_s10, %s125_s0 }
   0x5   :  { %p47_p2 = pnand %p45_p1, %p42_p0 }
   0x7   :  { %50 = shalt.err (!%p47_p2)
}
   0x8   :  { %s51_s15 = scalar_lea.vmem %s15_s7, 128  ;;  %p56_p4 = scmp.lt.s32.totalorder %s15_s7, %s15_s7 }
   0x9   :  { %p52_p3 = scmp.ne.s32.totalorder %s15_s7, %s51_s15  ;;  %p57_p5 = scmp.lt.s32.totalorder %s51_s15, %s51_s15 }
   0xb   :  { %p58_p6 = por %p57_p5, %p56_p4 }
   0xd   :  { %p59_p7 = pnand %p58_p6, %p52_p3 }
   0xf   :  { %62 = shalt.err (!%p59_p7)
}
  0x10   :  { %17 = dma.hbm_to_vmem [thread:$0]  %s125_s0, 128, %s15_s7, [#allocation3]  }
  0x11   :  { %85 = dma.done.wait [#allocation3], 128  }
  0x12   :  { %86 = vsyncadd [#allocation3], 4294967168  ;;  %s90_s18 = smov [#allocation5]   ;;  %v21_v0 = vld [vmem:[#allocation2] sm:$0xff] }
  0x13   :  { %s30_s19 = sshll.u32 %s90_s18, 4  ;;  %v22_v1 = vrot.slane %v21_v0, 7  ;;  %s31_s19 = int_to_ptr.vmem [resolvable:$true] %s30_s19 }
  0x14   :  { %s63_s20 = scalar_lea.vmem %s31_s19, 128  ;;  %p68_p9 = scmp.lt.s32.totalorder %s31_s19, %s31_s19 }
  0x15   :  { %23 = vst [vmem:[#allocation5] sm:$0xff] %v22_v1  ;;  %p64_p8 = scmp.ne.s32.totalorder %s31_s19, %s63_s20  ;;  %p69_p10 = scmp.lt.s32.totalorder %s63_s20, %s63_s20 }
  0x17   :  { %p70_p11 = por %p69_p10, %p68_p9 }
  0x19   :  { %p71_p12 = pnand %p70_p11, %p64_p8 }
  0x1b   :  { %74 = shalt.err (!%p71_p12)
}
  0x1c   :  { %s75_s23 = scalar_lea.hbm %s126_s1, 128 }
  0x1d   :  { %p76_p13 = scmp.ne.s32.totalorder %s126_s1, %s75_s23  ;;  %p79_p0 = scmp.lt.u32.totalorder %s75_s23, %s126_s1 }
  0x1f   :  { %p81_p1 = pnand %p79_p0, %p76_p13 }
  0x21   :  { %84 = shalt.err (!%p81_p1)
}
  0x22   :  { %33 = dma.vmem_to_hbm [thread:$0]  %s31_s19, 128, %s126_s1, [#allocation4]  }
  0x23   :  { %87 = dma.done.wait [#allocation4], 128  }
  0x24   :  { %88 = vsyncadd [#allocation4], 4294967168 }
  0x25   :  { %37 = vsyncpa [#allocation3], 1 }
  0x26   :  { %38 = vsyncpa [#allocation4], 1 }

</bundles_post_ra>
